<compile_context>
chip_gen: v7x
topology: tpu7x:2x2x1
jax: 0.10.0
libtpu: 0.0.40
codegen_flags: <defaults>
</compile_context>

<pallas_src>
import jax
import jax.numpy as jnp
from jax.experimental import pallas as pl
from jax.experimental.pallas import tpu as pltpu

LANE = 128


def _round_up(x, m):
    return ((x + m - 1) // m) * m


def _cdiv(a, b):
    return -(-a // b)


def _device_kind():
    try:
        return jax.devices()[0].device_kind.lower()
    except Exception:
        return ""


def _tensorcores_per_device(kind):
    # v4 / v5p (megacore) and v7x expose 2 TensorCores per JAX device; v5e/v6e have 1.
    return 2 if any(tag in kind for tag in ("v4", "v5p", "v7")) else 1


def _has_bf16_vpu(kind):
    # v6e / v7x VALUs handle bf16 natively; v5e and older do not.
    return any(tag in kind for tag in ("v6", "v7"))


def _choose_batch_tile(batch, n_cores, tm_cap=2048):
    """Fewest grid steps possible: one tile per TensorCore until the cap,
    then just enough tiles (kept a multiple of the core count)."""
    n_tiles = max(n_cores, _cdiv(batch, tm_cap))
    n_tiles = _round_up(n_tiles, n_cores)
    tm = _round_up(max(_cdiv(batch, n_tiles), 1), 16)
    batch_pad = _round_up(batch, tm)
    return tm, batch_pad


def _make_critic_kernel(num_hidden_layers, state_dim, action_dim,
                        compute_dtype, act_in_bf16):
    """Kernel computing the full critic MLP for one batch tile (weights resident)."""
    k0 = state_dim + action_dim

    def kernel(s_ref, a_ref, w0_ref, b0_ref, *rest):
        # rest = [w_h1, b_h1, ..., w_hK, b_hK, w_q, b_q, o_ref, x_scratch]
        x_ref = rest[-1]
        o_ref = rest[-2]
        wq_ref, bq_ref = rest[-4], rest[-3]
        hidden_refs = rest[:-4]

        # Fused cat([state, action], 1) + zero-pad of K to 128: pack both inputs
        # into a zeroed f32 scratch block, cast once for the MXU.
        x_ref[...] = jnp.zeros_like(x_ref)
        x_ref[:, 0:state_dim] = s_ref[...]
        x_ref[:, state_dim:k0] = a_ref[...]
        h = x_ref[...].astype(compute_dtype)

        def dense_relu(h, w_ref, b_ref):
            acc = jnp.dot(h, w_ref[...], preferred_element_type=jnp.float32)
            if act_in_bf16:
                # bf16 bias + ReLU (v6e/v7x): single cast of the MXU result.
                return jnp.maximum(acc.astype(compute_dtype)
                                   + b_ref[...].astype(compute_dtype), 0.0)
            # f32 bias + ReLU (v5e VPU has no bf16); one cast before the next dot.
            return jnp.maximum(acc + b_ref[...], 0.0).astype(compute_dtype)

        h = dense_relu(h, w0_ref, b0_ref)
        for k in range(num_hidden_layers):
            h = dense_relu(h, hidden_refs[2 * k], hidden_refs[2 * k + 1])

        # q head: 128 padded output lanes -> lane-dense (unmasked) store.
        o_ref[...] = (
            jnp.dot(h, wq_ref[...], preferred_element_type=jnp.float32)
            + bq_ref[...]
        )

    return kernel


def _init_linear(key, fan_in, fan_out):
    """Mimics PyTorch nn.Linear default init (uniform +-1/sqrt(fan_in)).
    Returns (W of shape (in, out), b of shape (1, out)) — transpose of torch layout."""
    kw, kb = jax.random.split(key)
    bound = 1.0 / jnp.sqrt(jnp.float32(fan_in))
    w = jax.random.uniform(kw, (fan_in, fan_out), jnp.float32, -bound, bound)
    b = jax.random.uniform(kb, (1, fan_out), jnp.float32, -bound, bound)
    return w, b


def build_critic_params(key, input_size, n_actions, hidden_size):
    """Raw f32 params matching the PyTorch module (input layer over in+act)."""
    keys = jax.random.split(key, len(hidden_size) + 1)
    w0, b0 = _init_linear(keys[0], input_size + n_actions, hidden_size[0])
    params = {"w0": w0, "b0": b0, "hidden": []}
    for k in range(len(hidden_size) - 1):
        params["hidden"].append(
            _init_linear(keys[1 + k], hidden_size[k], hidden_size[k + 1]))
    wq, bq = _init_linear(keys[-1], hidden_size[-1], 1)
    params["w_q"] = wq
    params["b_q"] = bq
    return params


def pack_critic_params(params, compute_dtype=jnp.bfloat16):
    """Zero-pad every weight to 128-aligned (K, N), pad the q head to 128 output
    lanes, cast weights to the MXU compute dtype.  Biases stay f32."""

    def pad_w(w):
        kin, kout = w.shape
        wp = jnp.zeros((_round_up(kin, LANE), _round_up(kout, LANE)), jnp.float32)
        return wp.at[:kin, :kout].set(w).astype(compute_dtype)

    def pad_b(b):
        b = b.reshape(1, -1)
        kout = b.shape[1]
        bp = jnp.zeros((1, _round_up(kout, LANE)), jnp.float32)
        return bp.at[:, :kout].set(b)

    return {
        "w0": pad_w(params["w0"]),
        "b0": pad_b(params["b0"]),
        "hidden": [(pad_w(w), pad_b(b)) for (w, b) in params["hidden"]],
        "w_q": pad_w(params["w_q"]),
        "b_q": pad_b(params["b_q"]),
    }


def critic_forward_pallas(state, action, packed, *, tm=None,
                          weight_buffer_count=1):
    """state: (B, input_size), action: (B, n_actions), packed = pack_critic_params(...)."""
    batch, state_dim = state.shape
    action_dim = action.shape[1]
    compute_dtype = packed["w0"].dtype
    k0_pad = packed["w0"].shape[0]
    hq_pad = packed["w_q"].shape[1]

    kind = _device_kind()
    n_cores = _tensorcores_per_device(kind)
    act_in_bf16 = _has_bf16_vpu(kind) and compute_dtype == jnp.bfloat16

    if tm is None:
        tm, batch_pad = _choose_batch_tile(batch, n_cores)
    else:
        batch_pad = _round_up(batch, tm)

    # Only the batch dim is padded host-side (zero rows are sliced off below);
    # concat / K-pad / compute-dtype cast all happen inside the kernel.
    state = state.astype(jnp.float32)
    action = action.astype(jnp.float32)
    if batch_pad != batch:
        state = jnp.pad(state, ((0, batch_pad - batch), (0, 0)))
        action = jnp.pad(action, ((0, batch_pad - batch), (0, 0)))

    weights = [packed["w0"], packed["b0"]]
    for (w, b) in packed["hidden"]:
        weights += [w, b]
    weights += [packed["w_q"], packed["b_q"]]

    kernel = _make_critic_kernel(len(packed["hidden"]), state_dim, action_dim,
                                 compute_dtype, act_in_bf16)
    grid = (batch_pad // tm,)

    mats = [packed["w0"]] + [w for (w, _) in packed["hidden"]] + [packed["w_q"]]
    flops = 2 * batch_pad * sum(int(w.shape[0]) * int(w.shape[1]) for w in mats)
    bytes_accessed = (
        batch_pad * (state_dim + action_dim) * 4
        + sum(int(w.size) * w.dtype.itemsize for w in weights)
        + batch_pad * hq_pad * 4
    )

    def make_call(wbuf):
        if wbuf == 2:
            w_specs = [pl.BlockSpec(w.shape, lambda i: (0, 0)) for w in weights]
        else:
            # Constant-index operands never change block: single-buffer them to
            # halve their resident VMEM footprint (matters on v7x / wide hiddens).
            w_specs = [pl.BlockSpec(w.shape, lambda i: (0, 0),
                                    pipeline_mode=pl.Buffered(wbuf))
                       for w in weights]
        in_specs = [pl.BlockSpec((tm, state_dim), lambda i: (i, 0)),
                    pl.BlockSpec((tm, action_dim), lambda i: (i, 0))] + w_specs
        return pl.pallas_call(
            kernel,
            grid=grid,
            in_specs=in_specs,
            out_specs=pl.BlockSpec((tm, hq_pad), lambda i: (i, 0)),
            out_shape=jax.ShapeDtypeStruct((batch_pad, hq_pad), jnp.float32),
            scratch_shapes=[pltpu.VMEM((tm, k0_pad), jnp.float32)],
            compiler_params=pltpu.CompilerParams(
                dimension_semantics=("parallel",),
                vmem_limit_bytes=32 * 1024 * 1024),   # legal on v7x (64 MiB) and v5e/v6e
            cost_estimate=pl.CostEstimate(
                flops=flops, transcendentals=0, bytes_accessed=bytes_accessed),
        )(state, action, *weights)

    if weight_buffer_count == 2:
        out = make_call(2)
    else:
        try:
            out = make_call(weight_buffer_count)
        except Exception:
            # Fallback: this jax build rejects Buffered(1); use default 2-deep buffering.
            out = make_call(2)

    # Drop batch padding and the padded q-head lanes (only column 0 is real).
    # Keep this slice in the same jit as the consumer so XLA fuses it.
    return out[:batch, :1]


def critic_forward_ref(state, action, params):
    """Exact f32 JAX reference matching the PyTorch forward."""
    x = jnp.concatenate([state, action], axis=1)
    h = jax.nn.relu(x @ params["w0"] + params["b0"])
    for (w, b) in params["hidden"]:
        h = jax.nn.relu(h @ w + b)
    return h @ params["w_q"] + params["b_q"]


def critic_forward_ref_kernel_numerics(state, action, params, act_in_bf16):
    """Pure-JAX reference mirroring the kernel numerics (bf16 operands, f32 acc,
    bf16 bias+ReLU on chips with a bf16 VPU)."""

    def mm(a, w):
        return jnp.dot(a.astype(jnp.bfloat16), w.astype(jnp.bfloat16),
                       preferred_element_type=jnp.float32)

    def dense_relu(h, w, b):
        acc = mm(h, w)
        if act_in_bf16:
            return jnp.maximum(acc.astype(jnp.bfloat16) + b.astype(jnp.bfloat16), 0.0)
        return jnp.maximum(acc + b, 0.0)

    x = jnp.concatenate([state, action], axis=1)
    h = dense_relu(x, params["w0"], params["b0"])
    for (w, b) in params["hidden"]:
        h = dense_relu(h, w, b)
    return mm(h, params["w_q"]) + params["b_q"]


if __name__ == "__main__":
    # Small shapes consistent with the module: SAC critic on flat observations.
    batch = 8
    input_size = 16      # state dim
    n_actions = 4        # action dim
    hidden_size = [32, 32]

    key = jax.random.PRNGKey(0)
    k_state, k_action, k_params = jax.random.split(key, 3)

    state = jax.random.normal(k_state, (batch, input_size), jnp.float32)
    action = jax.random.normal(k_action, (batch, n_actions), jnp.float32)

    params = build_critic_params(k_params, input_size, n_actions, hidden_size)
    packed = pack_critic_params(params)

    q = critic_forward_pallas(state, action, packed)
    q = jax.block_until_ready(q)
    assert q.shape == (batch, 1), q.shape

    # Tight check vs a reference with identical numerics.
    act_in_bf16 = _has_bf16_vpu(_device_kind())
    q_ref_k = critic_forward_ref_kernel_numerics(state, action, params, act_in_bf16)
    assert jnp.allclose(q, q_ref_k, atol=5e-3, rtol=5e-3), (q, q_ref_k)

    # Loose check vs the exact-f32 PyTorch-equivalent forward (bf16 operand drift).
    q_ref_f32 = critic_forward_ref(state, action, params)
    assert jnp.allclose(q, q_ref_f32, atol=5e-2, rtol=5e-2), (q, q_ref_f32)

    print("KERNEL_OK")
</pallas_src>

<mosaic_0001>
module attributes {stable_mosaic.version = 11 : i64} {
  func.func @kernel(%arg0: i32, %arg1: memref<16x16xf32, #tpu.memory_space<vmem>>, %arg2: memref<16x4xf32, #tpu.memory_space<vmem>>, %arg3: memref<128x128xbf16, #tpu.memory_space<vmem>>, %arg4: memref<1x128xf32, #tpu.memory_space<vmem>>, %arg5: memref<128x128xbf16, #tpu.memory_space<vmem>>, %arg6: memref<1x128xf32, #tpu.memory_space<vmem>>, %arg7: memref<128x128xbf16, #tpu.memory_space<vmem>>, %arg8: memref<1x128xf32, #tpu.memory_space<vmem>>, %arg9: memref<16x128xf32, #tpu.memory_space<vmem>>, %arg10: memref<16x128xf32, #tpu.memory_space<vmem>>) attributes {dimension_semantics = [#tpu.dimension_semantics<parallel>], iteration_bounds = array<i64: 1>, scalar_prefetch = 0 : i64, scratch_operands = 1 : i64, tpu.core_type = #tpu.core_type<tc>, window_params = [{transform_indices = @transform_0, window_bounds = array<i64: 16, 16>}, {transform_indices = @transform_1, window_bounds = array<i64: 16, 4>}, {pipeline_mode = #tpu.pipeline_mode<synchronous>, transform_indices = @transform_2, window_bounds = array<i64: 128, 128>}, {pipeline_mode = #tpu.pipeline_mode<synchronous>, transform_indices = @transform_3, window_bounds = array<i64: 1, 128>}, {pipeline_mode = #tpu.pipeline_mode<synchronous>, transform_indices = @transform_4, window_bounds = array<i64: 128, 128>}, {pipeline_mode = #tpu.pipeline_mode<synchronous>, transform_indices = @transform_5, window_bounds = array<i64: 1, 128>}, {pipeline_mode = #tpu.pipeline_mode<synchronous>, transform_indices = @transform_6, window_bounds = array<i64: 128, 128>}, {pipeline_mode = #tpu.pipeline_mode<synchronous>, transform_indices = @transform_7, window_bounds = array<i64: 1, 128>}, {transform_indices = @transform_8, window_bounds = array<i64: 16, 128>}]} {
    %cst = arith.constant 0.000000e+00 : f32
    %0 = vector.broadcast %cst : f32 to vector<16x128xf32>
    %c0 = arith.constant 0 : index
    %c0_0 = arith.constant 0 : index
    %1 = vector.load %arg10[%c0, %c0_0] : memref<16x128xf32, #tpu.memory_space<vmem>>, vector<16x128xf32>
    tpu.vector_store %arg10[%c0, %c0_0], %0 {strides = array<i32>} : memref<16x128xf32, #tpu.memory_space<vmem>>, vector<16x128xf32>,
    %c0_1 = arith.constant 0 : index
    %c0_2 = arith.constant 0 : index
    %2 = vector.load %arg1[%c0_1, %c0_2] : memref<16x16xf32, #tpu.memory_space<vmem>>, vector<16x16xf32>
    %c0_3 = arith.constant 0 : index
    %c0_4 = arith.constant 0 : index
    %3 = vector.load %arg10[%c0_3, %c0_4] : memref<16x128xf32, #tpu.memory_space<vmem>>, vector<16x16xf32>
    tpu.vector_store %arg10[%c0_3, %c0_4], %2 {strides = array<i32>} : memref<16x128xf32, #tpu.memory_space<vmem>>, vector<16x16xf32>,
    %c0_5 = arith.constant 0 : index
    %c0_6 = arith.constant 0 : index
    %4 = vector.load %arg2[%c0_5, %c0_6] : memref<16x4xf32, #tpu.memory_space<vmem>>, vector<16x4xf32>
    %c0_7 = arith.constant 0 : index
    %c16 = arith.constant 16 : index
    %5 = vector.load %arg10[%c0_7, %c16] : memref<16x128xf32, #tpu.memory_space<vmem>>, vector<16x4xf32>
    tpu.vector_store %arg10[%c0_7, %c16], %4 {strides = array<i32>} : memref<16x128xf32, #tpu.memory_space<vmem>>, vector<16x4xf32>,
    %c0_8 = arith.constant 0 : index
    %c0_9 = arith.constant 0 : index
    %6 = vector.load %arg10[%c0_8, %c0_9] : memref<16x128xf32, #tpu.memory_space<vmem>>, vector<16x128xf32>
    %7 = arith.truncf %6 : vector<16x128xf32> to vector<16x128xbf16>
    %c0_10 = arith.constant 0 : index
    %c0_11 = arith.constant 0 : index
    %8 = vector.load %arg3[%c0_10, %c0_11] : memref<128x128xbf16, #tpu.memory_space<vmem>>, vector<128x128xbf16>
    %cst_12 = arith.constant dense<0.000000e+00> : vector<16x128xf32>
    %9 = tpu.matmul %7, %8, %cst_12 {dimension_numbers = #tpu.dot_dimension_numbers<[1], [0], [0], [1], [0, 0, 1, 1], [], []>} : vector<16x128xbf16>, vector<128x128xbf16>, vector<16x128xf32> -> vector<16x128xf32>
    %c0_13 = arith.constant 0 : index
    %c0_14 = arith.constant 0 : index
    %10 = vector.load %arg4[%c0_13, %c0_14] : memref<1x128xf32, #tpu.memory_space<vmem>>, vector<1x128xf32>
    %11 = vector.broadcast %10 : vector<1x128xf32> to vector<16x128xf32>
    %12 = arith.addf %9, %11 : vector<16x128xf32>
    %cst_15 = arith.constant 0.000000e+00 : f32
    %13 = vector.broadcast %cst_15 : f32 to vector<16x128xf32>
    %14 = arith.maximumf %12, %13 : vector<16x128xf32>
    %15 = arith.truncf %14 : vector<16x128xf32> to vector<16x128xbf16>
    %c0_16 = arith.constant 0 : index
    %c0_17 = arith.constant 0 : index
    %16 = vector.load %arg5[%c0_16, %c0_17] : memref<128x128xbf16, #tpu.memory_space<vmem>>, vector<128x128xbf16>
    %cst_18 = arith.constant dense<0.000000e+00> : vector<16x128xf32>
    %17 = tpu.matmul %15, %16, %cst_18 {dimension_numbers = #tpu.dot_dimension_numbers<[1], [0], [0], [1], [0, 0, 1, 1], [], []>} : vector<16x128xbf16>, vector<128x128xbf16>, vector<16x128xf32> -> vector<16x128xf32>
    %c0_19 = arith.constant 0 : index
    %c0_20 = arith.constant 0 : index
    %18 = vector.load %arg6[%c0_19, %c0_20] : memref<1x128xf32, #tpu.memory_space<vmem>>, vector<1x128xf32>
    %19 = vector.broadcast %18 : vector<1x128xf32> to vector<16x128xf32>
    %20 = arith.addf %17, %19 : vector<16x128xf32>
    %cst_21 = arith.constant 0.000000e+00 : f32
    %21 = vector.broadcast %cst_21 : f32 to vector<16x128xf32>
    %22 = arith.maximumf %20, %21 : vector<16x128xf32>
    %23 = arith.truncf %22 : vector<16x128xf32> to vector<16x128xbf16>
    %c0_22 = arith.constant 0 : index
    %c0_23 = arith.constant 0 : index
    %24 = vector.load %arg7[%c0_22, %c0_23] : memref<128x128xbf16, #tpu.memory_space<vmem>>, vector<128x128xbf16>
    %cst_24 = arith.constant dense<0.000000e+00> : vector<16x128xf32>
    %25 = tpu.matmul %23, %24, %cst_24 {dimension_numbers = #tpu.dot_dimension_numbers<[1], [0], [0], [1], [0, 0, 1, 1], [], []>} : vector<16x128xbf16>, vector<128x128xbf16>, vector<16x128xf32> -> vector<16x128xf32>
    %c0_25 = arith.constant 0 : index
    %c0_26 = arith.constant 0 : index
    %26 = vector.load %arg8[%c0_25, %c0_26] : memref<1x128xf32, #tpu.memory_space<vmem>>, vector<1x128xf32>
    %27 = vector.broadcast %26 : vector<1x128xf32> to vector<16x128xf32>
    %28 = arith.addf %25, %27 : vector<16x128xf32>
    %c0_27 = arith.constant 0 : index
    %c0_28 = arith.constant 0 : index
    %29 = vector.load %arg9[%c0_27, %c0_28] : memref<16x128xf32, #tpu.memory_space<vmem>>, vector<16x128xf32>
    tpu.vector_store %arg9[%c0_27, %c0_28], %28 {strides = array<i32>} : memref<16x128xf32, #tpu.memory_space<vmem>>, vector<16x128xf32>,
    return
  }
  func.func @transform_0(%arg0: i32) -> (i32, i32) {
    %c0_i32 = arith.constant 0 : i32
    %c0_i32_0 = arith.constant 0 : i32
    return %arg0, %c0_i32 : i32, i32
  }
  func.func @transform_1(%arg0: i32) -> (i32, i32) {
    %c0_i32 = arith.constant 0 : i32
    %c0_i32_0 = arith.constant 0 : i32
    return %arg0, %c0_i32 : i32, i32
  }
  func.func @transform_2(%arg0: i32) -> (i32, i32) {
    %c0_i32 = arith.constant 0 : i32
    %c0_i32_0 = arith.constant 0 : i32
    %c0_i32_1 = arith.constant 0 : i32
    return %c0_i32, %c0_i32_0 : i32, i32
  }
  func.func @transform_3(%arg0: i32) -> (i32, i32) {
    %c0_i32 = arith.constant 0 : i32
    %c0_i32_0 = arith.constant 0 : i32
    %c0_i32_1 = arith.constant 0 : i32
    return %c0_i32, %c0_i32_0 : i32, i32
  }
  func.func @transform_4(%arg0: i32) -> (i32, i32) {
    %c0_i32 = arith.constant 0 : i32
    %c0_i32_0 = arith.constant 0 : i32
    %c0_i32_1 = arith.constant 0 : i32
    return %c0_i32, %c0_i32_0 : i32, i32
  }
  func.func @transform_5(%arg0: i32) -> (i32, i32) {
    %c0_i32 = arith.constant 0 : i32
    %c0_i32_0 = arith.constant 0 : i32
    %c0_i32_1 = arith.constant 0 : i32
    return %c0_i32, %c0_i32_0 : i32, i32
  }
  func.func @transform_6(%arg0: i32) -> (i32, i32) {
    %c0_i32 = arith.constant 0 : i32
    %c0_i32_0 = arith.constant 0 : i32
    %c0_i32_1 = arith.constant 0 : i32
    return %c0_i32, %c0_i32_0 : i32, i32
  }
  func.func @transform_7(%arg0: i32) -> (i32, i32) {
    %c0_i32 = arith.constant 0 : i32
    %c0_i32_0 = arith.constant 0 : i32
    %c0_i32_1 = arith.constant 0 : i32
    return %c0_i32, %c0_i32_0 : i32, i32
  }
  func.func @transform_8(%arg0: i32) -> (i32, i32) {
    %c0_i32 = arith.constant 0 : i32
    %c0_i32_0 = arith.constant 0 : i32
    return %arg0, %c0_i32 : i32, i32
  }
}

module attributes {stable_mosaic.version = 11 : i64} {
  func.func @kernel(%arg0: i32, %arg1: memref<16x16xf32, #tpu.memory_space<vmem>>, %arg2: memref<16x4xf32, #tpu.memory_space<vmem>>, %arg3: memref<128x128xbf16, #tpu.memory_space<vmem>>, %arg4: memref<1x128xf32, #tpu.memory_space<vmem>>, %arg5: memref<128x128xbf16, #tpu.memory_space<vmem>>, %arg6: memref<1x128xf32, #tpu.memory_space<vmem>>, %arg7: memref<128x128xbf16, #tpu.memory_space<vmem>>, %arg8: memref<1x128xf32, #tpu.memory_space<vmem>>, %arg9: memref<16x128xf32, #tpu.memory_space<vmem>>, %arg10: memref<16x128xf32, #tpu.memory_space<vmem>>) attributes {dimension_semantics = [#tpu.dimension_semantics<parallel>], iteration_bounds = array<i64: 1>, scalar_prefetch = 0 : i64, scratch_operands = 1 : i64, tpu.core_type = #tpu.core_type<tc>, window_params = [{transform_indices = @transform_0, window_bounds = array<i64: 16, 16>}, {transform_indices = @transform_1, window_bounds = array<i64: 16, 4>}, {pipeline_mode = #tpu.pipeline_mode<synchronous>, transform_indices = @transform_2, window_bounds = array<i64: 128, 128>}, {pipeline_mode = #tpu.pipeline_mode<synchronous>, transform_indices = @transform_3, window_bounds = array<i64: 1, 128>}, {pipeline_mode = #tpu.pipeline_mode<synchronous>, transform_indices = @transform_4, window_bounds = array<i64: 128, 128>}, {pipeline_mode = #tpu.pipeline_mode<synchronous>, transform_indices = @transform_5, window_bounds = array<i64: 1, 128>}, {pipeline_mode = #tpu.pipeline_mode<synchronous>, transform_indices = @transform_6, window_bounds = array<i64: 128, 128>}, {pipeline_mode = #tpu.pipeline_mode<synchronous>, transform_indices = @transform_7, window_bounds = array<i64: 1, 128>}, {transform_indices = @transform_8, window_bounds = array<i64: 16, 128>}]} {
    %cst = arith.constant 0.000000e+00 : f32
    %0 = vector.broadcast %cst : f32 to vector<16x128xf32>
    %c0 = arith.constant 0 : index
    %c0_0 = arith.constant 0 : index
    %1 = vector.load %arg10[%c0, %c0_0] : memref<16x128xf32, #tpu.memory_space<vmem>>, vector<16x128xf32>
    tpu.vector_store %arg10[%c0, %c0_0], %0 {strides = array<i32>} : memref<16x128xf32, #tpu.memory_space<vmem>>, vector<16x128xf32>,
    %c0_1 = arith.constant 0 : index
    %c0_2 = arith.constant 0 : index
    %2 = vector.load %arg1[%c0_1, %c0_2] : memref<16x16xf32, #tpu.memory_space<vmem>>, vector<16x16xf32>
    %c0_3 = arith.constant 0 : index
    %c0_4 = arith.constant 0 : index
    %3 = vector.load %arg10[%c0_3, %c0_4] : memref<16x128xf32, #tpu.memory_space<vmem>>, vector<16x16xf32>
    tpu.vector_store %arg10[%c0_3, %c0_4], %2 {strides = array<i32>} : memref<16x128xf32, #tpu.memory_space<vmem>>, vector<16x16xf32>,
    %c0_5 = arith.constant 0 : index
    %c0_6 = arith.constant 0 : index
    %4 = vector.load %arg2[%c0_5, %c0_6] : memref<16x4xf32, #tpu.memory_space<vmem>>, vector<16x4xf32>
    %c0_7 = arith.constant 0 : index
    %c16 = arith.constant 16 : index
    %5 = vector.load %arg10[%c0_7, %c16] : memref<16x128xf32, #tpu.memory_space<vmem>>, vector<16x4xf32>
    tpu.vector_store %arg10[%c0_7, %c16], %4 {strides = array<i32>} : memref<16x128xf32, #tpu.memory_space<vmem>>, vector<16x4xf32>,
    %c0_8 = arith.constant 0 : index
    %c0_9 = arith.constant 0 : index
    %6 = vector.load %arg10[%c0_8, %c0_9] : memref<16x128xf32, #tpu.memory_space<vmem>>, vector<16x128xf32>
    %7 = arith.truncf %6 : vector<16x128xf32> to vector<16x128xbf16>
    %c0_10 = arith.constant 0 : index
    %c0_11 = arith.constant 0 : index
    %8 = vector.load %arg3[%c0_10, %c0_11] : memref<128x128xbf16, #tpu.memory_space<vmem>>, vector<128x128xbf16>
    %cst_12 = arith.constant dense<0.000000e+00> : vector<16x128xf32>
    %9 = tpu.matmul %7, %8, %cst_12 {dimension_numbers = #tpu.dot_dimension_numbers<[1], [0], [0], [1], [0, 0, 1, 1], [], []>} : vector<16x128xbf16>, vector<128x128xbf16>, vector<16x128xf32> -> vector<16x128xf32>
    %c0_13 = arith.constant 0 : index
    %c0_14 = arith.constant 0 : index
    %10 = vector.load %arg4[%c0_13, %c0_14] : memref<1x128xf32, #tpu.memory_space<vmem>>, vector<1x128xf32>
    %11 = vector.broadcast %10 : vector<1x128xf32> to vector<16x128xf32>
    %12 = arith.addf %9, %11 : vector<16x128xf32>
    %cst_15 = arith.constant 0.000000e+00 : f32
    %13 = vector.broadcast %cst_15 : f32 to vector<16x128xf32>
    %14 = arith.maximumf %12, %13 : vector<16x128xf32>
    %15 = arith.truncf %14 : vector<16x128xf32> to vector<16x128xbf16>
    %c0_16 = arith.constant 0 : index
    %c0_17 = arith.constant 0 : index
    %16 = vector.load %arg5[%c0_16, %c0_17] : memref<128x128xbf16, #tpu.memory_space<vmem>>, vector<128x128xbf16>
    %cst_18 = arith.constant dense<0.000000e+00> : vector<16x128xf32>
    %17 = tpu.matmul %15, %16, %cst_18 {dimension_numbers = #tpu.dot_dimension_numbers<[1], [0], [0], [1], [0, 0, 1, 1], [], []>} : vector<16x128xbf16>, vector<128x128xbf16>, vector<16x128xf32> -> vector<16x128xf32>
    %c0_19 = arith.constant 0 : index
    %c0_20 = arith.constant 0 : index
    %18 = vector.load %arg6[%c0_19, %c0_20] : memref<1x128xf32, #tpu.memory_space<vmem>>, vector<1x128xf32>
    %19 = vector.broadcast %18 : vector<1x128xf32> to vector<16x128xf32>
    %20 = arith.addf %17, %19 : vector<16x128xf32>
    %cst_21 = arith.constant 0.000000e+00 : f32
    %21 = vector.broadcast %cst_21 : f32 to vector<16x128xf32>
    %22 = arith.maximumf %20, %21 : vector<16x128xf32>
    %23 = arith.truncf %22 : vector<16x128xf32> to vector<16x128xbf16>
    %c0_22 = arith.constant 0 : index
    %c0_23 = arith.constant 0 : index
    %24 = vector.load %arg7[%c0_22, %c0_23] : memref<128x128xbf16, #tpu.memory_space<vmem>>, vector<128x128xbf16>
    %cst_24 = arith.constant dense<0.000000e+00> : vector<16x128xf32>
    %25 = tpu.matmul %23, %24, %cst_24 {dimension_numbers = #tpu.dot_dimension_numbers<[1], [0], [0], [1], [0, 0, 1, 1], [], []>} : vector<16x128xbf16>, vector<128x128xbf16>, vector<16x128xf32> -> vector<16x128xf32>
    %c0_25 = arith.constant 0 : index
    %c0_26 = arith.constant 0 : index
    %26 = vector.load %arg8[%c0_25, %c0_26] : memref<1x128xf32, #tpu.memory_space<vmem>>, vector<1x128xf32>
    %27 = vector.broadcast %26 : vector<1x128xf32> to vector<16x128xf32>
    %28 = arith.addf %25, %27 : vector<16x128xf32>
    %c0_27 = arith.constant 0 : index
    %c0_28 = arith.constant 0 : index
    %29 = vector.load %arg9[%c0_27, %c0_28] : memref<16x128xf32, #tpu.memory_space<vmem>>, vector<16x128xf32>
    tpu.vector_store %arg9[%c0_27, %c0_28], %28 {strides = array<i32>} : memref<16x128xf32, #tpu.memory_space<vmem>>, vector<16x128xf32>,
    return
  }
  func.func @transform_0(%arg0: i32) -> (i32, i32) {
    %c0_i32 = arith.constant 0 : i32
    %c0_i32_0 = arith.constant 0 : i32
    return %arg0, %c0_i32 : i32, i32
  }
  func.func @transform_1(%arg0: i32) -> (i32, i32) {
    %c0_i32 = arith.constant 0 : i32
    %c0_i32_0 = arith.constant 0 : i32
    return %arg0, %c0_i32 : i32, i32
  }
  func.func @transform_2(%arg0: i32) -> (i32, i32) {
    %c0_i32 = arith.constant 0 : i32
    %c0_i32_0 = arith.constant 0 : i32
    %c0_i32_1 = arith.constant 0 : i32
    return %c0_i32, %c0_i32_0 : i32, i32
  }
  func.func @transform_3(%arg0: i32) -> (i32, i32) {
    %c0_i32 = arith.constant 0 : i32
    %c0_i32_0 = arith.constant 0 : i32
    %c0_i32_1 = arith.constant 0 : i32
    return %c0_i32, %c0_i32_0 : i32, i32
  }
  func.func @transform_4(%arg0: i32) -> (i32, i32) {
    %c0_i32 = arith.constant 0 : i32
    %c0_i32_0 = arith.constant 0 : i32
    %c0_i32_1 = arith.constant 0 : i32
    return %c0_i32, %c0_i32_0 : i32, i32
  }
  func.func @transform_5(%arg0: i32) -> (i32, i32) {
    %c0_i32 = arith.constant 0 : i32
    %c0_i32_0 = arith.constant 0 : i32
    %c0_i32_1 = arith.constant 0 : i32
    return %c0_i32, %c0_i32_0 : i32, i32
  }
  func.func @transform_6(%arg0: i32) -> (i32, i32) {
    %c0_i32 = arith.constant 0 : i32
    %c0_i32_0 = arith.constant 0 : i32
    %c0_i32_1 = arith.constant 0 : i32
    return %c0_i32, %c0_i32_0 : i32, i32
  }
  func.func @transform_7(%arg0: i32) -> (i32, i32) {
    %c0_i32 = arith.constant 0 : i32
    %c0_i32_0 = arith.constant 0 : i32
    %c0_i32_1 = arith.constant 0 : i32
    return %c0_i32, %c0_i32_0 : i32, i32
  }
  func.func @transform_8(%arg0: i32) -> (i32, i32) {
    %c0_i32 = arith.constant 0 : i32
    %c0_i32_0 = arith.constant 0 : i32
    return %arg0, %c0_i32 : i32, i32
  }
}

</mosaic_0001>

<bundles_post_ra>
// kernel: tpu_custom_call.1
= control target key start
LH: loop header
LB: loop body
LE: loop exit
PB: predicated region body
PF: predicated region fallthrough
CT: control target
= control target key end

     0   :  { %13 = vsyncpa [#allocation4], 0  ;;  %s873_s0 = inlined_call_operand.vmem [shape: f32[16,16], index: 0, kind: input, shape index: {}]   ;;  %s874_s1 = inlined_call_operand.vmem [shape: f32[16,4], index: 1, kind: input, shape index: {}]   ;;  %s875_s2 = inlined_call_operand.hbm [shape: bf16[128,128], index: 2, kind: input, shape index: {}]   ;;  %s876_s3 = inlined_call_operand.vmem [shape: f32[1,128], index: 3, kind: input, shape index: {}]   ;;  %s877_s4 = inlined_call_operand.hbm [shape: bf16[128,128], index: 4, kind: input, shape index: {}]   ;;  %s878_s5 = inlined_call_operand.vmem [shape: f32[1,128], index: 5, kind: input, shape index: {}]   ;;  %s879_s6 = inlined_call_operand.hbm [shape: bf16[128,128], index: 6, kind: input, shape index: {}]   ;;  %s880_s7 = inlined_call_operand.vmem [shape: f32[1,128], index: 7, kind: input, shape index: {}]   ;;  %s881_s8 = inlined_call_operand.hbm [shape: f32[16,128], index: 8, kind: output, shape index: {}]  }
   0x1   :  { %14 = vsyncpa [#allocation7], 0 }
   0x2   :  { %15 = vsyncpa [#allocation5], 0  ;;  %s700_s27 = smov [#allocation6]   ;;  %s701_s29 = smov [#allocation3]  }
   0x3   :  { %s39_s28 = sshll.u32 %s700_s27, 4  ;;  %s25_s30 = sshll.u32 %s701_s29, 4  ;;  %s40_s28 = int_to_ptr.vmem [resolvable:$true] %s39_s28  ;;  %s756_s30 = int_to_ptr.vmem [resolvable:$true] %s25_s30 }
   0x4   :  { %s606_s11 = scalar_lea.hbm %s877_s4, 1024 }
   0x5   :  { %p607_p0 = scmp.ne.s32.totalorder %s877_s4, %s606_s11  ;;  %p610_p1 = scmp.lt.u32.totalorder %s606_s11, %s877_s4 }
   0x7   :  { %p612_p2 = pnand %p610_p1, %p607_p0 }
   0x9   :  { %615 = shalt.err (!%p612_p2)
}
   0xa   :  { %s616_s16 = scalar_lea.vmem %s40_s28, 1024  ;;  %p621_p4 = scmp.lt.s32.totalorder %s40_s28, %s40_s28 }
   0xb   :  { %p617_p3 = scmp.ne.s32.totalorder %s40_s28, %s616_s16  ;;  %p622_p5 = scmp.lt.s32.totalorder %s616_s16, %s616_s16 }
   0xd   :  { %p623_p6 = por %p622_p5, %p621_p4 }
   0xf   :  { %p624_p7 = pnand %p623_p6, %p617_p3 }
  0x11   :  { %627 = shalt.err (!%p624_p7)
}
  0x12   :  { %s702_s17 = smov 64   ;;  %s703_s18 = smov 4  }
  0x13   :  { %45 = dma.hbm_to_vmem [thread:$0]  %s877_s4, 1024, %s40_s28, [#allocation7], %s702_s17, %s702_s17, %s703_s18  }
  0x14   :  { %s628_s23 = scalar_lea.hbm %s875_s2, 1024 }
  0x15   :  { %p629_p8 = scmp.ne.s32.totalorder %s875_s2, %s628_s23  ;;  %p632_p9 = scmp.lt.u32.totalorder %s628_s23, %s875_s2 }
  0x17   :  { %p634_p10 = pnand %p632_p9, %p629_p8 }
  0x19   :  { %637 = shalt.err (!%p634_p10)
}
  0x1a   :  { %s638_s29 = scalar_lea.vmem %s756_s30, 1024  ;;  %p643_p12 = scmp.lt.s32.totalorder %s756_s30, %s756_s30 }
  0x1b   :  { %p639_p11 = scmp.ne.s32.totalorder %s756_s30, %s638_s29  ;;  %p644_p13 = scmp.lt.s32.totalorder %s638_s29, %s638_s29 }
  0x1d   :  { %p645_p0 = por %p644_p13, %p643_p12 }
  0x1f   :  { %p646_p1 = pnand %p645_p0, %p639_p11 }
  0x21   :  { %649 = shalt.err (!%p646_p1)
}
  0x22   :  { %31 = dma.hbm_to_vmem [thread:$0]  %s875_s2, 1024, %s756_s30, [#allocation4], %s702_s17, %s702_s17, %s703_s18  }
  0x23   :  { %s704_s9 = smov [#allocation8]   ;;  %s650_s13 = scalar_lea.hbm %s879_s6, 1024 }
  0x24   :  { %s53_s10 = sshll.u32 %s704_s9, 4  ;;  %p651_p2 = scmp.ne.s32.totalorder %s879_s6, %s650_s13  ;;  %s54_s10 = int_to_ptr.vmem [resolvable:$true] %s53_s10 }
  0x25   :  { %p654_p3 = scmp.lt.u32.totalorder %s650_s13, %s879_s6 }
  0x27   :  { %p656_p4 = pnand %p654_p3, %p651_p2 }
  0x29   :  { %659 = shalt.err (!%p656_p4)
}
  0x2a   :  { %s660_s20 = scalar_lea.vmem %s54_s10, 1024  ;;  %p665_p6 = scmp.lt.s32.totalorder %s54_s10, %s54_s10 }
  0x2b   :  { %p661_p5 = scmp.ne.s32.totalorder %s54_s10, %s660_s20  ;;  %p666_p7 = scmp.lt.s32.totalorder %s660_s20, %s660_s20 }
  0x2d   :  { %p667_p8 = por %p666_p7, %p665_p6 }
  0x2f   :  { %p668_p9 = pnand %p667_p8, %p661_p5 }
  0x31   :  { %671 = shalt.err (!%p668_p9)
}
  0x32   :  { %59 = dma.hbm_to_vmem [thread:$0]  %s879_s6, 1024, %s54_s10, [#allocation7], %s702_s17, %s702_s17, %s703_s18  }
  0x33   :  { %694 = dma.done.wait [#allocation4], 1024  }
  0x34   :  { %695 = vsyncadd [#allocation4], 4294966272 }
  0x35   :  { %696 = dma.done.wait [#allocation7], 2048  }
  0x36   :  { %697 = vsyncadd [#allocation7], 4294965248  ;;  %v705_v0 = vmov 0.0   ;;  %vm706_vm0 = vmmov 0   ;;  %v79_v1 = vld [vmem:[%s874_s1] sm:$0xff]  ;;  %s707_s18 = smov 16  }
  0x37   :  { %511 = vmatprep.subr.bf16.mxu0 %v705_v0  ;;  %72 = vst [vmem:[#allocation2] sm:$0xff] %v705_v0  ;;  %73 = vst [vmem:[#allocation2 + $0x8] sm:$0xff] %v705_v0  ;;  %531 = vmatprep.subr.bf16.mxu1 %v705_v0  ;;  %v582_v2 = vld [vmem:[#allocation3] sm:$0xff]   ;;  %v80_v3 = vld [vmem:[%s874_s1 + $0x8] sm:$0xff]  ;;  %vm76_vm1 = vcmask 130048   ;;  %vm89_vm2 = vcmask 162944  }
  0x38   :  { %527 = vmatprep.mubr.msk.bf16.mxu0 %vm706_vm0, %v705_v0  ;;  %547 = vmatprep.mubr.msk.bf16.mxu1 %vm706_vm0, %v705_v0  ;;  %v583_v4 = vld [vmem:[#allocation3 + $0x8] sm:$0xff]   ;;  %v74_v5 = vld [vmem:[%s873_s0] sm:$0xff]  ;;  %v75_v7 = vld [vmem:[%s873_s0 + $0x8] sm:$0xff]  ;;  %s708_s28 = smov [#allocation9]  }
  0x39   :  { %83 = vrot.lane.b32.xlu0 %v79_v1, %s707_s18  ;;  %512 = vmatpush3.bf16.msra.mxu0 %v582_v2  ;;  %v584_v6 = vld [vmem:[#allocation3 + $0x10] sm:$0xff]   ;;  %77 = vst.msk [vmem:[#allocation2] sm:$0xff] %vm76_vm1, %v74_v5  ;;  %78 = vst.msk [vmem:[#allocation2 + $0x8] sm:$0xff] %vm76_vm1, %v75_v7  ;;  %v590_v8 = vld [vmem:[#allocation6] sm:$0xff]   ;;  %s444_s9 = sshll.u32 %s708_s28, 4  ;;  %s445_s9 = int_to_ptr.vmem [resolvable:$true] %s444_s9 }
  0x3a   :  { %513 = vmatprep.subr.bf16.mxu0 %v705_v0  ;;  %v585_v9 = vld [vmem:[#allocation3 + $0x18] sm:$0xff]   ;;  %532 = vmatpush3.bf16.msra.mxu1 %v590_v8  ;;  %v591_v10 = vld [vmem:[#allocation6 + $0x8] sm:$0xff]   ;;  %v586_v11 = vld [vmem:[#allocation3 + $0x20] sm:$0xff]   ;;  %p677_p11 = scmp.lt.s32.totalorder %s445_s9, %s445_s9 }
  0x3b   :  { %533 = vmatprep.subr.bf16.mxu1 %v705_v0  ;;  %v592_v12 = vld [vmem:[#allocation6 + $0x10] sm:$0xff]   ;;  %v587_v13 = vld [vmem:[#allocation3 + $0x28] sm:$0xff]   ;;  %v593_v14 = vld [vmem:[#allocation6 + $0x18] sm:$0xff]  }
  0x3c   :  { %v588_v15 = vld [vmem:[#allocation3 + $0x30] sm:$0xff]   ;;  %v594_v16 = vld [vmem:[#allocation6 + $0x20] sm:$0xff]   ;;  %v589_v17 = vld [vmem:[#allocation3 + $0x38] sm:$0xff]  }
  0x3d   :  { %85 = vrot.lane.b32.xlu0 %v80_v3, %s707_s18  ;;  %514 = vmatpush3.bf16.msra.mxu0 %v583_v4  ;;  %v595_v18 = vld [vmem:[#allocation6 + $0x28] sm:$0xff]   ;;  %v596_v24 = vld [vmem:[#allocation6 + $0x30] sm:$0xff]   ;;  %v597_v25 = vld [vmem:[#allocation6 + $0x38] sm:$0xff]  }
  0x3e   :  { %515 = vmatprep.subr.bf16.mxu0 %v705_v0  ;;  %534 = vmatpush3.bf16.msra.mxu1 %v591_v10  ;;  %v598_v26 = vld [vmem:[#allocation8] sm:$0xff]   ;;  %v599_v27 = vld [vmem:[#allocation8 + $0x8] sm:$0xff]   ;;  %v600_v28 = vld [vmem:[#allocation8 + $0x10] sm:$0xff]  }
  0x3f   :  { %535 = vmatprep.subr.bf16.mxu1 %v705_v0  ;;  %v601_v29 = vld [vmem:[#allocation8 + $0x18] sm:$0xff]   ;;  %v602_v30 = vld [vmem:[#allocation8 + $0x20] sm:$0xff]   ;;  %v603_v31 = vld [vmem:[#allocation8 + $0x28] sm:$0xff]  }
  0x40   :  { %v457_v32 = vld [vmem:[%s876_s3] ss:$0 sm:$0xff]  ;;  %v605_v43 = vld [vmem:[#allocation8 + $0x38] sm:$0xff]  }
  0x41   :  { %516 = vmatpush3.bf16.msra.mxu0 %v584_v6  ;;  %v604_v42 = vld [vmem:[#allocation8 + $0x30] sm:$0xff]  }
  0x42   :  { %517 = vmatprep.subr.bf16.mxu0 %v705_v0  ;;  %536 = vmatpush3.bf16.msra.mxu1 %v592_v12  ;;  %v466_v44 = vld [vmem:[%s878_s5] ss:$0 sm:$0xff]  ;;  %s672_s5 = scalar_lea.vmem %s445_s9, 256 }
  0x43   :  { %537 = vmatprep.subr.bf16.mxu1 %v705_v0  ;;  %v475_v54 = vld [vmem:[%s880_s7] ss:$0 sm:$0xff]  ;;  %p673_p10 = scmp.ne.s32.totalorder %s445_s9, %s672_s5  ;;  %p678_p12 = scmp.lt.s32.totalorder %s672_s5, %s672_s5 }
  0x45   :  { %518 = vmatpush3.bf16.msra.mxu0 %v585_v9  ;;  %p679_p13 = por %p678_p12, %p677_p11 }
  0x46   :  { %519 = vmatprep.subr.bf16.mxu0 %v705_v0  ;;  %538 = vmatpush3.bf16.msra.mxu1 %v593_v14 }
  0x47   :  { %539 = vmatprep.subr.bf16.mxu1 %v705_v0  ;;  %p680_p0 = pnand %p679_p13, %p673_p10 }
  0x49   :  { %520 = vmatpush3.bf16.msra.mxu0 %v586_v11 }
  0x4a   :  { %521 = vmatprep.subr.bf16.mxu0 %v705_v0  ;;  %540 = vmatpush3.bf16.msra.mxu1 %v594_v16 }
  0x4b   :  { %541 = vmatprep.subr.bf16.mxu1 %v705_v0 }
  0x4d   :  { %522 = vmatpush3.bf16.msra.mxu0 %v587_v13 }
  0x4e   :  { %523 = vmatprep.subr.bf16.mxu0 %v705_v0  ;;  %542 = vmatpush3.bf16.msra.mxu1 %v595_v18 }
  0x4f   :  { %543 = vmatprep.subr.bf16.mxu1 %v705_v0 }
  0x51   :  { %524 = vmatpush3.bf16.msra.mxu0 %v588_v15 }
  0x52   :  { %525 = vmatprep.subr.bf16.mxu0 %v705_v0  ;;  %544 = vmatpush3.bf16.msra.mxu1 %v596_v24 }
  0x53   :  { %545 = vmatprep.subr.bf16.mxu1 %v705_v0 }
  0x55   :  { %526 = vmatpush3.bf16.msra.mxu0 %v589_v17 }
  0x56   :  { %551 = vmatprep.subr.bf16.mxu0 %v705_v0  ;;  %546 = vmatpush3.bf16.msra.mxu1 %v597_v25 }
  0xab   :  { %v84_v19 = vpop.permute.xlu0 %83 }
  0xac   :  { %90 = vst.msk [vmem:[#allocation2] sm:$0xff] %vm89_vm2, %v84_v19 }
  0xaf   :  { %v86_v20 = vpop.permute.xlu0 %85 }
  0xb0   :  { %91 = vst.msk [vmem:[#allocation2 + $0x8] sm:$0xff] %vm89_vm2, %v86_v20 }
  0xb3   :  { %v92_v21 = vld [vmem:[#allocation2] sm:$0xff] }
  0xb7   :  { %v93_v22 = vld [vmem:[#allocation2 + $0x8] sm:$0xff] }
  0xb8   :  { %v94_v23 = vpack.c.bf16 %v93_v22, %v92_v21 }
  0xba   :  { %528 = vmatmul.mubr.bf16.vlgmr.msra.gmra.mrb[0].mxu0 %v94_v23 }
  0xbb   :  { %567 = vmatprep.mubr.msk.bf16.mxu0 %vm706_vm0, %v705_v0  ;;  %552 = vmatpush3.bf16.msra.mxu0 %v598_v26 }
  0xbc   :  { %553 = vmatprep.subr.bf16.mxu0 %v705_v0 }
  0xbf   :  { %554 = vmatpush3.bf16.msra.mxu0 %v599_v27 }
  0xc0   :  { %555 = vmatprep.subr.bf16.mxu0 %v705_v0 }
  0xc3   :  { %556 = vmatpush3.bf16.msra.mxu0 %v600_v28 }
  0xc4   :  { %557 = vmatprep.subr.bf16.mxu0 %v705_v0 }
  0xc7   :  { %558 = vmatpush3.bf16.msra.mxu0 %v601_v29 }
  0xc8   :  { %559 = vmatprep.subr.bf16.mxu0 %v705_v0 }
  0xcb   :  { %560 = vmatpush3.bf16.msra.mxu0 %v602_v30 }
  0xcc   :  { %561 = vmatprep.subr.bf16.mxu0 %v705_v0 }
  0xcf   :  { %562 = vmatpush3.bf16.msra.mxu0 %v603_v31 }
  0xd0   :  { %563 = vmatprep.subr.bf16.mxu0 %v705_v0 }
  0xd3   :  { %564 = vmatpush3.bf16.msra.mxu0 %v604_v42 }
  0xd4   :  { %565 = vmatprep.subr.bf16.mxu0 %v705_v0 }
  0xd7   :  { %566 = vmatpush3.bf16.msra.mxu0 %v605_v43 }
 0x18d   :  { %v200_v33 = vpop.f32.mrb[0].mxu0 }
 0x18e   :  { %v201_v34 = vadd.f32 %v457_v32, %v200_v33  ;;  %v529_v35 = vpop.f32.mrb[1].mxu0 }
 0x18f   :  { %v203_v36 = vpop.f32.mrb[2].mxu0 }
 0x190   :  { %v204_v37 = vadd.f32 %v457_v32, %v203_v36  ;;  %v530_v38 = vpop.f32.mrb[3].mxu0  ;;  %v207_v39 = vmax.f32 %v201_v34, 0.0 }
 0x192   :  { %v208_v40 = vmax.f32 %v204_v37, 0.0 }
 0x194   :  { %v209_v41 = vpack.c.bf16 %v208_v40, %v207_v39 }
 0x196   :  { %548 = vmatmul.mubr.bf16.vlgmr.msra.gmra.mrb[0].mxu1 %v209_v41 }
 0x269   :  { %v315_v45 = vpop.f32.mrb[0].mxu1 }
 0x26a   :  { %v316_v46 = vadd.f32 %v466_v44, %v315_v45  ;;  %v549_v47 = vpop.f32.mrb[1].mxu1 }
 0x26b   :  { %v318_v48 = vpop.f32.mrb[2].mxu1 }
 0x26c   :  { %v319_v49 = vadd.f32 %v466_v44, %v318_v48  ;;  %v550_v50 = vpop.f32.mrb[3].mxu1  ;;  %v322_v51 = vmax.f32 %v316_v46, 0.0 }
 0x26e   :  { %v323_v52 = vmax.f32 %v319_v49, 0.0 }
 0x270   :  { %v324_v53 = vpack.c.bf16 %v323_v52, %v322_v51 }
 0x272   :  { %568 = vmatmul.mubr.bf16.vlgmr.msra.gmra.mrb[4].mxu0 %v324_v53 }
 0x345   :  { %v430_v55 = vpop.f32.mrb[4].mxu0 }
 0x346   :  { %v431_v56 = vadd.f32 %v475_v54, %v430_v55  ;;  %v569_v57 = vpop.f32.mrb[5].mxu0 }
 0x347   :  { %v433_v58 = vpop.f32.mrb[6].mxu0 }
 0x348   :  { %437 = vst [vmem:[#allocation9] sm:$0xff] %v431_v56  ;;  %v434_v59 = vadd.f32 %v475_v54, %v433_v58  ;;  %v570_v60 = vpop.f32.mrb[7].mxu0 }
 0x34a   :  { %438 = vst [vmem:[#allocation9 + $0x8] sm:$0xff] %v434_v59 }
 0x34b   :  { %683 = shalt.err (!%p680_p0)
}
 0x34c   :  { %s684_s11 = scalar_lea.hbm %s881_s8, 256 }
 0x34d   :  { %p685_p1 = scmp.ne.s32.totalorder %s881_s8, %s684_s11  ;;  %p688_p2 = scmp.lt.u32.totalorder %s684_s11, %s881_s8 }
 0x34f   :  { %p690_p3 = pnand %p688_p2, %p685_p1 }
 0x351   :  { %693 = shalt.err (!%p690_p3)
}
 0x352   :  { %s709_s16 = smov 128   ;;  %s710_s19 = smov 8  }
 0x353   :  { %450 = dma.vmem_to_hbm [thread:$0]  %s445_s9, 256, %s881_s8, [#allocation5], %s709_s16, %s709_s16, %s710_s19  }
 0x354   :  { %698 = dma.done.wait [#allocation5], 256  }
 0x355   :  { %699 = vsyncadd [#allocation5], 4294967040 }
 0x356   :  { %454 = vsyncpa [#allocation4], 1 }
 0x357   :  { %455 = vsyncpa [#allocation7], 1 }
 0x358   :  { %456 = vsyncpa [#allocation5], 1 }

// kernel: tpu_custom_call.1
= control target key start
LH: loop header
LB: loop body
LE: loop exit
PB: predicated region body
PF: predicated region fallthrough
CT: control target
= control target key end

     0   :  { %13 = vsyncpa [#allocation4], 0  ;;  %s873_s0 = inlined_call_operand.vmem [shape: f32[16,16], index: 0, kind: input, shape index: {}]   ;;  %s874_s1 = inlined_call_operand.vmem [shape: f32[16,4], index: 1, kind: input, shape index: {}]   ;;  %s875_s2 = inlined_call_operand.hbm [shape: bf16[128,128], index: 2, kind: input, shape index: {}]   ;;  %s876_s3 = inlined_call_operand.vmem [shape: f32[1,128], index: 3, kind: input, shape index: {}]   ;;  %s877_s4 = inlined_call_operand.hbm [shape: bf16[128,128], index: 4, kind: input, shape index: {}]   ;;  %s878_s5 = inlined_call_operand.vmem [shape: f32[1,128], index: 5, kind: input, shape index: {}]   ;;  %s879_s6 = inlined_call_operand.hbm [shape: bf16[128,128], index: 6, kind: input, shape index: {}]   ;;  %s880_s7 = inlined_call_operand.vmem [shape: f32[1,128], index: 7, kind: input, shape index: {}]   ;;  %s881_s8 = inlined_call_operand.hbm [shape: f32[16,128], index: 8, kind: output, shape index: {}]  }
   0x1   :  { %14 = vsyncpa [#allocation7], 0 }
   0x2   :  { %15 = vsyncpa [#allocation5], 0  ;;  %s700_s27 = smov [#allocation6]   ;;  %s701_s29 = smov [#allocation3]  }
   0x3   :  { %s39_s28 = sshll.u32 %s700_s27, 4  ;;  %s25_s30 = sshll.u32 %s701_s29, 4  ;;  %s40_s28 = int_to_ptr.vmem [resolvable:$true] %s39_s28  ;;  %s756_s30 = int_to_ptr.vmem [resolvable:$true] %s25_s30 }
   0x4   :  { %s606_s11 = scalar_lea.hbm %s877_s4, 1024 }
   0x5   :  { %p607_p0 = scmp.ne.s32.totalorder %s877_s4, %s606_s11  ;;  %p610_p1 = scmp.lt.u32.totalorder %s606_s11, %s877_s4 }
   0x7   :  { %p612_p2 = pnand %p610_p1, %p607_p0 }
   0x9   :  { %615 = shalt.err (!%p612_p2)
}
   0xa   :  { %s616_s16 = scalar_lea.vmem %s40_s28, 1024  ;;  %p621_p4 = scmp.lt.s32.totalorder %s40_s28, %s40_s28 }
   0xb   :  { %p617_p3 = scmp.ne.s32.totalorder %s40_s28, %s616_s16  ;;  %p622_p5 = scmp.lt.s32.totalorder %s616_s16, %s616_s16 }
   0xd   :  { %p623_p6 = por %p622_p5, %p621_p4 }
   0xf   :  { %p624_p7 = pnand %p623_p6, %p617_p3 }
  0x11   :  { %627 = shalt.err (!%p624_p7)
}
  0x12   :  { %s702_s17 = smov 64   ;;  %s703_s18 = smov 4  }
  0x13   :  { %45 = dma.hbm_to_vmem [thread:$0]  %s877_s4, 1024, %s40_s28, [#allocation7], %s702_s17, %s702_s17, %s703_s18  }
  0x14   :  { %s628_s23 = scalar_lea.hbm %s875_s2, 1024 }
  0x15   :  { %p629_p8 = scmp.ne.s32.totalorder %s875_s2, %s628_s23  ;;  %p632_p9 = scmp.lt.u32.totalorder %s628_s23, %s875_s2 }
  0x17   :  { %p634_p10 = pnand %p632_p9, %p629_p8 }
  0x19   :  { %637 = shalt.err (!%p634_p10)
}
  0x1a   :  { %s638_s29 = scalar_lea.vmem %s756_s30, 1024  ;;  %p643_p12 = scmp.lt.s32.totalorder %s756_s30, %s756_s30 }
  0x1b   :  { %p639_p11 = scmp.ne.s32.totalorder %s756_s30, %s638_s29  ;;  %p644_p13 = scmp.lt.s32.totalorder %s638_s29, %s638_s29 }
  0x1d   :  { %p645_p0 = por %p644_p13, %p643_p12 }
  0x1f   :  { %p646_p1 = pnand %p645_p0, %p639_p11 }
  0x21   :  { %649 = shalt.err (!%p646_p1)
}
  0x22   :  { %31 = dma.hbm_to_vmem [thread:$0]  %s875_s2, 1024, %s756_s30, [#allocation4], %s702_s17, %s702_s17, %s703_s18  }
  0x23   :  { %s704_s9 = smov [#allocation8]   ;;  %s650_s13 = scalar_lea.hbm %s879_s6, 1024 }
  0x24   :  { %s53_s10 = sshll.u32 %s704_s9, 4  ;;  %p651_p2 = scmp.ne.s32.totalorder %s879_s6, %s650_s13  ;;  %s54_s10 = int_to_ptr.vmem [resolvable:$true] %s53_s10 }
  0x25   :  { %p654_p3 = scmp.lt.u32.totalorder %s650_s13, %s879_s6 }
  0x27   :  { %p656_p4 = pnand %p654_p3, %p651_p2 }
  0x29   :  { %659 = shalt.err (!%p656_p4)
}
  0x2a   :  { %s660_s20 = scalar_lea.vmem %s54_s10, 1024  ;;  %p665_p6 = scmp.lt.s32.totalorder %s54_s10, %s54_s10 }
  0x2b   :  { %p661_p5 = scmp.ne.s32.totalorder %s54_s10, %s660_s20  ;;  %p666_p7 = scmp.lt.s32.totalorder %s660_s20, %s660_s20 }
  0x2d   :  { %p667_p8 = por %p666_p7, %p665_p6 }
  0x2f   :  { %p668_p9 = pnand %p667_p8, %p661_p5 }
  0x31   :  { %671 = shalt.err (!%p668_p9)
}
  0x32   :  { %59 = dma.hbm_to_vmem [thread:$0]  %s879_s6, 1024, %s54_s10, [#allocation7], %s702_s17, %s702_s17, %s703_s18  }
  0x33   :  { %694 = dma.done.wait [#allocation4], 1024  }
  0x34   :  { %695 = vsyncadd [#allocation4], 4294966272 }
  0x35   :  { %696 = dma.done.wait [#allocation7], 2048  }
  0x36   :  { %697 = vsyncadd [#allocation7], 4294965248  ;;  %v705_v0 = vmov 0.0   ;;  %vm706_vm0 = vmmov 0   ;;  %v79_v1 = vld [vmem:[%s874_s1] sm:$0xff]  ;;  %s707_s18 = smov 16  }
  0x37   :  { %511 = vmatprep.subr.bf16.mxu0 %v705_v0  ;;  %72 = vst [vmem:[#allocation2] sm:$0xff] %v705_v0  ;;  %73 = vst [vmem:[#allocation2 + $0x8] sm:$0xff] %v705_v0  ;;  %531 = vmatprep.subr.bf16.mxu1 %v705_v0  ;;  %v582_v2 = vld [vmem:[#allocation3] sm:$0xff]   ;;  %v80_v3 = vld [vmem:[%s874_s1 + $0x8] sm:$0xff]  ;;  %vm76_vm1 = vcmask 130048   ;;  %vm89_vm2 = vcmask 162944  }
  0x38   :  { %527 = vmatprep.mubr.msk.bf16.mxu0 %vm706_vm0, %v705_v0  ;;  %547 = vmatprep.mubr.msk.bf16.mxu1 %vm706_vm0, %v705_v0  ;;  %v583_v4 = vld [vmem:[#allocation3 + $0x8] sm:$0xff]   ;;  %v74_v5 = vld [vmem:[%s873_s0] sm:$0xff]  ;;  %v75_v7 = vld [vmem:[%s873_s0 + $0x8] sm:$0xff]  ;;  %s708_s28 = smov [#allocation9]  }
  0x39   :  { %83 = vrot.lane.b32.xlu0 %v79_v1, %s707_s18  ;;  %512 = vmatpush3.bf16.msra.mxu0 %v582_v2  ;;  %v584_v6 = vld [vmem:[#allocation3 + $0x10] sm:$0xff]   ;;  %77 = vst.msk [vmem:[#allocation2] sm:$0xff] %vm76_vm1, %v74_v5  ;;  %78 = vst.msk [vmem:[#allocation2 + $0x8] sm:$0xff] %vm76_vm1, %v75_v7  ;;  %v590_v8 = vld [vmem:[#allocation6] sm:$0xff]   ;;  %s444_s9 = sshll.u32 %s708_s28, 4  ;;  %s445_s9 = int_to_ptr.vmem [resolvable:$true] %s444_s9 }
  0x3a   :  { %513 = vmatprep.subr.bf16.mxu0 %v705_v0  ;;  %v585_v9 = vld [vmem:[#allocation3 + $0x18] sm:$0xff]   ;;  %532 = vmatpush3.bf16.msra.mxu1 %v590_v8  ;;  %v591_v10 = vld [vmem:[#allocation6 + $0x8] sm:$0xff]   ;;  %v586_v11 = vld [vmem:[#allocation3 + $0x20] sm:$0xff]   ;;  %p677_p11 = scmp.lt.s32.totalorder %s445_s9, %s445_s9 }
  0x3b   :  { %533 = vmatprep.subr.bf16.mxu1 %v705_v0  ;;  %v592_v12 = vld [vmem:[#allocation6 + $0x10] sm:$0xff]   ;;  %v587_v13 = vld [vmem:[#allocation3 + $0x28] sm:$0xff]   ;;  %v593_v14 = vld [vmem:[#allocation6 + $0x18] sm:$0xff]  }
  0x3c   :  { %v588_v15 = vld [vmem:[#allocation3 + $0x30] sm:$0xff]   ;;  %v594_v16 = vld [vmem:[#allocation6 + $0x20] sm:$0xff]   ;;  %v589_v17 = vld [vmem:[#allocation3 + $0x38] sm:$0xff]  }
  0x3d   :  { %85 = vrot.lane.b32.xlu0 %v80_v3, %s707_s18  ;;  %514 = vmatpush3.bf16.msra.mxu0 %v583_v4  ;;  %v595_v18 = vld [vmem:[#allocation6 + $0x28] sm:$0xff]   ;;  %v596_v24 = vld [vmem:[#allocation6 + $0x30] sm:$0xff]   ;;  %v597_v25 = vld [vmem:[#allocation6 + $0x38] sm:$0xff]  }
  0x3e   :  { %515 = vmatprep.subr.bf16.mxu0 %v705_v0  ;;  %534 = vmatpush3.bf16.msra.mxu1 %v591_v10  ;;  %v598_v26 = vld [vmem:[#allocation8] sm:$0xff]   ;;  %v599_v27 = vld [vmem:[#allocation8 + $0x8] sm:$0xff]   ;;  %v600_v28 = vld [vmem:[#allocation8 + $0x10] sm:$0xff]  }
  0x3f   :  { %535 = vmatprep.subr.bf16.mxu1 %v705_v0  ;;  %v601_v29 = vld [vmem:[#allocation8 + $0x18] sm:$0xff]   ;;  %v602_v30 = vld [vmem:[#allocation8 + $0x20] sm:$0xff]   ;;  %v603_v31 = vld [vmem:[#allocation8 + $0x28] sm:$0xff]  }
  0x40   :  { %v457_v32 = vld [vmem:[%s876_s3] ss:$0 sm:$0xff]  ;;  %v605_v43 = vld [vmem:[#allocation8 + $0x38] sm:$0xff]  }
  0x41   :  { %516 = vmatpush3.bf16.msra.mxu0 %v584_v6  ;;  %v604_v42 = vld [vmem:[#allocation8 + $0x30] sm:$0xff]  }
  0x42   :  { %517 = vmatprep.subr.bf16.mxu0 %v705_v0  ;;  %536 = vmatpush3.bf16.msra.mxu1 %v592_v12  ;;  %v466_v44 = vld [vmem:[%s878_s5] ss:$0 sm:$0xff]  ;;  %s672_s5 = scalar_lea.vmem %s445_s9, 256 }
  0x43   :  { %537 = vmatprep.subr.bf16.mxu1 %v705_v0  ;;  %v475_v54 = vld [vmem:[%s880_s7] ss:$0 sm:$0xff]  ;;  %p673_p10 = scmp.ne.s32.totalorder %s445_s9, %s672_s5  ;;  %p678_p12 = scmp.lt.s32.totalorder %s672_s5, %s672_s5 }
  0x45   :  { %518 = vmatpush3.bf16.msra.mxu0 %v585_v9  ;;  %p679_p13 = por %p678_p12, %p677_p11 }
  0x46   :  { %519 = vmatprep.subr.bf16.mxu0 %v705_v0  ;;  %538 = vmatpush3.bf16.msra.mxu1 %v593_v14 }
  0x47   :  { %539 = vmatprep.subr.bf16.mxu1 %v705_v0  ;;  %p680_p0 = pnand %p679_p13, %p673_p10 }
  0x49   :  { %520 = vmatpush3.bf16.msra.mxu0 %v586_v11 }
  0x4a   :  { %521 = vmatprep.subr.bf16.mxu0 %v705_v0  ;;  %540 = vmatpush3.bf16.msra.mxu1 %v594_v16 }
  0x4b   :  { %541 = vmatprep.subr.bf16.mxu1 %v705_v0 }
  0x4d   :  { %522 = vmatpush3.bf16.msra.mxu0 %v587_v13 }
  0x4e   :  { %523 = vmatprep.subr.bf16.mxu0 %v705_v0  ;;  %542 = vmatpush3.bf16.msra.mxu1 %v595_v18 }
  0x4f   :  { %543 = vmatprep.subr.bf16.mxu1 %v705_v0 }
  0x51   :  { %524 = vmatpush3.bf16.msra.mxu0 %v588_v15 }
  0x52   :  { %525 = vmatprep.subr.bf16.mxu0 %v705_v0  ;;  %544 = vmatpush3.bf16.msra.mxu1 %v596_v24 }
  0x53   :  { %545 = vmatprep.subr.bf16.mxu1 %v705_v0 }
  0x55   :  { %526 = vmatpush3.bf16.msra.mxu0 %v589_v17 }
  0x56   :  { %551 = vmatprep.subr.bf16.mxu0 %v705_v0  ;;  %546 = vmatpush3.bf16.msra.mxu1 %v597_v25 }
  0xab   :  { %v84_v19 = vpop.permute.xlu0 %83 }
  0xac   :  { %90 = vst.msk [vmem:[#allocation2] sm:$0xff] %vm89_vm2, %v84_v19 }
  0xaf   :  { %v86_v20 = vpop.permute.xlu0 %85 }
  0xb0   :  { %91 = vst.msk [vmem:[#allocation2 + $0x8] sm:$0xff] %vm89_vm2, %v86_v20 }
  0xb3   :  { %v92_v21 = vld [vmem:[#allocation2] sm:$0xff] }
  0xb7   :  { %v93_v22 = vld [vmem:[#allocation2 + $0x8] sm:$0xff] }
  0xb8   :  { %v94_v23 = vpack.c.bf16 %v93_v22, %v92_v21 }
  0xba   :  { %528 = vmatmul.mubr.bf16.vlgmr.msra.gmra.mrb[0].mxu0 %v94_v23 }
  0xbb   :  { %567 = vmatprep.mubr.msk.bf16.mxu0 %vm706_vm0, %v705_v0  ;;  %552 = vmatpush3.bf16.msra.mxu0 %v598_v26 }
  0xbc   :  { %553 = vmatprep.subr.bf16.mxu0 %v705_v0 }
  0xbf   :  { %554 = vmatpush3.bf16.msra.mxu0 %v599_v27 }
  0xc0   :  { %555 = vmatprep.subr.bf16.mxu0 %v705_v0 }
  0xc3   :  { %556 = vmatpush3.bf16.msra.mxu0 %v600_v28 }
  0xc4   :  { %557 = vmatprep.subr.bf16.mxu0 %v705_v0 }
  0xc7   :  { %558 = vmatpush3.bf16.msra.mxu0 %v601_v29 }
  0xc8   :  { %559 = vmatprep.subr.bf16.mxu0 %v705_v0 }
  0xcb   :  { %560 = vmatpush3.bf16.msra.mxu0 %v602_v30 }
  0xcc   :  { %561 = vmatprep.subr.bf16.mxu0 %v705_v0 }
  0xcf   :  { %562 = vmatpush3.bf16.msra.mxu0 %v603_v31 }
  0xd0   :  { %563 = vmatprep.subr.bf16.mxu0 %v705_v0 }
  0xd3   :  { %564 = vmatpush3.bf16.msra.mxu0 %v604_v42 }
  0xd4   :  { %565 = vmatprep.subr.bf16.mxu0 %v705_v0 }
  0xd7   :  { %566 = vmatpush3.bf16.msra.mxu0 %v605_v43 }
 0x18d   :  { %v200_v33 = vpop.f32.mrb[0].mxu0 }
 0x18e   :  { %v201_v34 = vadd.f32 %v457_v32, %v200_v33  ;;  %v529_v35 = vpop.f32.mrb[1].mxu0 }
 0x18f   :  { %v203_v36 = vpop.f32.mrb[2].mxu0 }
 0x190   :  { %v204_v37 = vadd.f32 %v457_v32, %v203_v36  ;;  %v530_v38 = vpop.f32.mrb[3].mxu0  ;;  %v207_v39 = vmax.f32 %v201_v34, 0.0 }
 0x192   :  { %v208_v40 = vmax.f32 %v204_v37, 0.0 }
 0x194   :  { %v209_v41 = vpack.c.bf16 %v208_v40, %v207_v39 }
 0x196   :  { %548 = vmatmul.mubr.bf16.vlgmr.msra.gmra.mrb[0].mxu1 %v209_v41 }
 0x269   :  { %v315_v45 = vpop.f32.mrb[0].mxu1 }
 0x26a   :  { %v316_v46 = vadd.f32 %v466_v44, %v315_v45  ;;  %v549_v47 = vpop.f32.mrb[1].mxu1 }
 0x26b   :  { %v318_v48 = vpop.f32.mrb[2].mxu1 }
 0x26c   :  { %v319_v49 = vadd.f32 %v466_v44, %v318_v48  ;;  %v550_v50 = vpop.f32.mrb[3].mxu1  ;;  %v322_v51 = vmax.f32 %v316_v46, 0.0 }
 0x26e   :  { %v323_v52 = vmax.f32 %v319_v49, 0.0 }
 0x270   :  { %v324_v53 = vpack.c.bf16 %v323_v52, %v322_v51 }
 0x272   :  { %568 = vmatmul.mubr.bf16.vlgmr.msra.gmra.mrb[4].mxu0 %v324_v53 }
 0x345   :  { %v430_v55 = vpop.f32.mrb[4].mxu0 }
 0x346   :  { %v431_v56 = vadd.f32 %v475_v54, %v430_v55  ;;  %v569_v57 = vpop.f32.mrb[5].mxu0 }
 0x347   :  { %v433_v58 = vpop.f32.mrb[6].mxu0 }
 0x348   :  { %437 = vst [vmem:[#allocation9] sm:$0xff] %v431_v56  ;;  %v434_v59 = vadd.f32 %v475_v54, %v433_v58  ;;  %v570_v60 = vpop.f32.mrb[7].mxu0 }
 0x34a   :  { %438 = vst [vmem:[#allocation9 + $0x8] sm:$0xff] %v434_v59 }
 0x34b   :  { %683 = shalt.err (!%p680_p0)
}
 0x34c   :  { %s684_s11 = scalar_lea.hbm %s881_s8, 256 }
 0x34d   :  { %p685_p1 = scmp.ne.s32.totalorder %s881_s8, %s684_s11  ;;  %p688_p2 = scmp.lt.u32.totalorder %s684_s11, %s881_s8 }
 0x34f   :  { %p690_p3 = pnand %p688_p2, %p685_p1 }
 0x351   :  { %693 = shalt.err (!%p690_p3)
}
 0x352   :  { %s709_s16 = smov 128   ;;  %s710_s19 = smov 8  }
 0x353   :  { %450 = dma.vmem_to_hbm [thread:$0]  %s445_s9, 256, %s881_s8, [#allocation5], %s709_s16, %s709_s16, %s710_s19  }
 0x354   :  { %698 = dma.done.wait [#allocation5], 256  }
 0x355   :  { %699 = vsyncadd [#allocation5], 4294967040 }
 0x356   :  { %454 = vsyncpa [#allocation4], 1 }
 0x357   :  { %455 = vsyncpa [#allocation7], 1 }
 0x358   :  { %456 = vsyncpa [#allocation5], 1 }

</bundles_post_ra>
